<compile_context>
chip_gen: v7x
topology: tpu7x:2x2x1
jax: 0.10.0
libtpu: 0.0.40
codegen_flags: <defaults>
</compile_context>

<pallas_src>
import functools

import jax
import jax.numpy as jnp
from jax.experimental import pallas as pl
from jax.experimental.pallas import tpu as pltpu

NEG_SLOPE = 0.01  # PyTorch nn.LeakyReLU default


def _leaky_relu(x):
    return jnp.where(x > 0, x, NEG_SLOPE * x)


def _round_up(x, m):
    return pl.cdiv(x, m) * m


def critic_kernel(x_ref, w1_ref, b1_ref, w2_ref, b2_ref, w3_ref, b3_ref, o_ref):
    # Entire 3-layer MLP fused on the current batch tile; weights stay resident.
    x = x_ref[...]  # f32 or bf16; MXU accumulates in f32 below.

    h1 = jnp.dot(x, w1_ref[...], preferred_element_type=jnp.float32) + b1_ref[...]
    h1 = _leaky_relu(h1)

    h2 = jnp.dot(h1.astype(w2_ref.dtype), w2_ref[...],
                 preferred_element_type=jnp.float32) + b2_ref[...]
    h2 = _leaky_relu(h2)

    out = jnp.dot(h2.astype(w3_ref.dtype), w3_ref[...],
                  preferred_element_type=jnp.float32) + b3_ref[...]
    o_ref[...] = out.astype(o_ref.dtype)


@functools.partial(jax.jit, static_argnames=("block_b", "use_bf16"))
def critic_forward(x, params, block_b=512, use_bf16=False):
    """x: (B, D) float32. Returns (B, 1) float32."""
    w1, b1, w2, b2, w3, b3 = params
    B, D = x.shape
    H = w1.shape[1]          # 128
    O = w3.shape[1]          # 1
    O_PAD = 128              # lane-dense output width

    # Pad the last layer to 128 output lanes (zero columns) -> dense stores,
    # and the MXU pass for the last layer costs the same as (128,1) anyway.
    w3p = jnp.zeros((H, O_PAD), jnp.float32).at[:, :O].set(w3)
    b3p = jnp.zeros((1, O_PAD), jnp.float32).at[:, :O].set(b3)

    # Effective batch tile: multiple of 8, no larger than the (padded) batch.
    bb = max(8, min(int(block_b), int(_round_up(B, 8))))
    bb = int(_round_up(bb, 8))
    B_pad = int(_round_up(B, bb))
    nb = B_pad // bb

    if B_pad != B:
        x = jnp.pad(x, ((0, B_pad - B), (0, 0)))  # explicit zero-pad: no garbage reads

    if use_bf16:
        # Halves the streaming x DMA and feeds the native bf16 MXU path
        # (slightly different numerics vs f32 reference).
        x = x.astype(jnp.bfloat16)
        w1 = w1.astype(jnp.bfloat16)
        w2 = w2.astype(jnp.bfloat16)
        w3p = w3p.astype(jnp.bfloat16)
    itemsize = 2 if use_bf16 else 4

    # Advisory cost estimate for XLA's scheduler.
    flops = 2 * B_pad * (D * H + H * H + H * O_PAD)
    bytes_accessed = (B_pad * D * itemsize                      # x
                      + (D * H + H * H + H * O_PAD) * itemsize  # weights
                      + (2 * H + O_PAD) * 4                     # biases
                      + B_pad * O_PAD * 4)                      # output
    cost = pl.CostEstimate(flops=flops, transcendentals=0,
                           bytes_accessed=bytes_accessed)

    # Rough resident-VMEM footprint (double-buffered tiles + weights); raise the
    # scoped limit only when the default would be too small (large D / block_b).
    vmem_needed = (2 * bb * D * itemsize                         # x double-buffer
                   + 2 * bb * O_PAD * 4                          # out double-buffer
                   + 2 * (D * H + H * H + H * O_PAD) * itemsize  # weights
                   + 2 * (2 * H + O_PAD) * 4)                    # biases
    compiler_kwargs = dict(dimension_semantics=("parallel",))
    if vmem_needed > 24 * 1024 * 1024:
        compiler_kwargs["vmem_limit_bytes"] = min(int(vmem_needed * 3 // 2),
                                                  100 * 1024 * 1024)

    grid_spec = pltpu.PrefetchScalarGridSpec(
        num_scalar_prefetch=0,
        grid=(nb,),
        in_specs=[
            pl.BlockSpec((bb, D), lambda i: (i, 0)),      # x tile over batch (streamed)
            pl.BlockSpec((D, H), lambda i: (0, 0)),       # w1 (resident)
            pl.BlockSpec((1, H), lambda i: (0, 0)),       # b1
            pl.BlockSpec((H, H), lambda i: (0, 0)),       # w2
            pl.BlockSpec((1, H), lambda i: (0, 0)),       # b2
            pl.BlockSpec((H, O_PAD), lambda i: (0, 0)),   # w3 (padded to 128 lanes)
            pl.BlockSpec((1, O_PAD), lambda i: (0, 0)),   # b3 (padded)
        ],
        out_specs=pl.BlockSpec((bb, O_PAD), lambda i: (i, 0)),   # lane-dense output
    )

    out = pl.pallas_call(
        critic_kernel,
        out_shape=jax.ShapeDtypeStruct((B_pad, O_PAD), jnp.float32),
        grid_spec=grid_spec,
        compiler_params=pltpu.CompilerParams(**compiler_kwargs),
        cost_estimate=cost,
    )(x, w1, b1, w2, b2, w3p, b3p)

    return out[:B, :O]


def init_critic_params(key, input_dim, hidden=128):
    """Deterministic init mirroring PyTorch Linear's U(-1/sqrt(fan_in), 1/sqrt(fan_in)).
    Weights stored as (in_features, out_features)."""
    def linear(k, fan_in, fan_out):
        kw, kb = jax.random.split(k)
        bound = 1.0 / jnp.sqrt(fan_in)
        w = jax.random.uniform(kw, (fan_in, fan_out), jnp.float32, -bound, bound)
        b = jax.random.uniform(kb, (1, fan_out), jnp.float32, -bound, bound)
        return w, b

    k1, k2, k3 = jax.random.split(key, 3)
    w1, b1 = linear(k1, input_dim, hidden)
    w2, b2 = linear(k2, hidden, hidden)
    w3, b3 = linear(k3, hidden, 1)
    return (w1, b1, w2, b2, w3, b3)


def critic_reference(x, params):
    w1, b1, w2, b2, w3, b3 = params
    h1 = _leaky_relu(x @ w1 + b1)
    h2 = _leaky_relu(h1 @ w2 + b2)
    return h2 @ w3 + b3


if __name__ == "__main__":
    key = jax.random.PRNGKey(0)
    k_x, k_p, k_x2 = jax.random.split(key, 3)

    input_dim = 32
    params = init_critic_params(k_p, input_dim)

    # Case 1: small batch (single tile), f32, strict check vs reference.
    x = jax.random.normal(k_x, (8, input_dim), jnp.float32)
    out = jax.block_until_ready(critic_forward(x, params))
    ref = critic_reference(x, params)
    assert out.shape == (8, 1), out.shape
    assert jnp.allclose(out, ref, atol=1e-5, rtol=1e-5), (
        float(jnp.max(jnp.abs(out - ref))))

    # Case 2: batch not divisible by the tile, multiple grid steps (exercises
    # padding + megacore-shardable grid).
    x2 = jax.random.normal(k_x2, (300, input_dim), jnp.float32)
    out2 = jax.block_until_ready(critic_forward(x2, params, block_b=128))
    ref2 = critic_reference(x2, params)
    assert out2.shape == (300, 1), out2.shape
    assert jnp.allclose(out2, ref2, atol=1e-5, rtol=1e-5), (
        float(jnp.max(jnp.abs(out2 - ref2))))

    # Case 3: bf16 streaming path (v6e/v7x optimization) -- looser tolerance.
    out3 = jax.block_until_ready(critic_forward(x2, params, block_b=128, use_bf16=True))
    assert out3.shape == (300, 1), out3.shape
    assert jnp.allclose(out3, ref2, atol=5e-2, rtol=5e-2), (
        float(jnp.max(jnp.abs(out3 - ref2))))

    print("KERNEL_OK")
</pallas_src>

<mosaic_0001>
module attributes {stable_mosaic.version = 11 : i64} {
  func.func @critic_kernel(%arg0: i32, %arg1: memref<8x32xf32, #tpu.memory_space<vmem>>, %arg2: memref<32x128xf32, #tpu.memory_space<vmem>>, %arg3: memref<1x128xf32, #tpu.memory_space<vmem>>, %arg4: memref<128x128xf32, #tpu.memory_space<vmem>>, %arg5: memref<1x128xf32, #tpu.memory_space<vmem>>, %arg6: memref<128x128xf32, #tpu.memory_space<vmem>>, %arg7: memref<1x128xf32, #tpu.memory_space<vmem>>, %arg8: memref<8x128xf32, #tpu.memory_space<vmem>>) attributes {dimension_semantics = [#tpu.dimension_semantics<parallel>], iteration_bounds = array<i64: 1>, scalar_prefetch = 0 : i64, scratch_operands = 0 : i64, tpu.core_type = #tpu.core_type<tc>, window_params = [{transform_indices = @transform_0, window_bounds = array<i64: 8, 32>}, {pipeline_mode = #tpu.pipeline_mode<synchronous>, transform_indices = @transform_1, window_bounds = array<i64: 32, 128>}, {pipeline_mode = #tpu.pipeline_mode<synchronous>, transform_indices = @transform_2, window_bounds = array<i64: 1, 128>}, {pipeline_mode = #tpu.pipeline_mode<synchronous>, transform_indices = @transform_3, window_bounds = array<i64: 128, 128>}, {pipeline_mode = #tpu.pipeline_mode<synchronous>, transform_indices = @transform_4, window_bounds = array<i64: 1, 128>}, {pipeline_mode = #tpu.pipeline_mode<synchronous>, transform_indices = @transform_5, window_bounds = array<i64: 128, 128>}, {pipeline_mode = #tpu.pipeline_mode<synchronous>, transform_indices = @transform_6, window_bounds = array<i64: 1, 128>}, {transform_indices = @transform_7, window_bounds = array<i64: 8, 128>}]} {
    %c0 = arith.constant 0 : index
    %c0_0 = arith.constant 0 : index
    %0 = vector.load %arg1[%c0, %c0_0] : memref<8x32xf32, #tpu.memory_space<vmem>>, vector<8x32xf32>
    %c0_1 = arith.constant 0 : index
    %c0_2 = arith.constant 0 : index
    %1 = vector.load %arg2[%c0_1, %c0_2] : memref<32x128xf32, #tpu.memory_space<vmem>>, vector<32x128xf32>
    %cst = arith.constant dense<0.000000e+00> : vector<8x128xf32>
    %2 = tpu.matmul %0, %1, %cst {dimension_numbers = #tpu.dot_dimension_numbers<[1], [0], [0], [1], [0, 0, 1, 1], [], []>} : vector<8x32xf32>, vector<32x128xf32>, vector<8x128xf32> -> vector<8x128xf32>
    %c0_3 = arith.constant 0 : index
    %c0_4 = arith.constant 0 : index
    %3 = vector.load %arg3[%c0_3, %c0_4] : memref<1x128xf32, #tpu.memory_space<vmem>>, vector<1x128xf32>
    %4 = vector.broadcast %3 : vector<1x128xf32> to vector<8x128xf32>
    %5 = arith.addf %2, %4 : vector<8x128xf32>
    %cst_5 = arith.constant 0.000000e+00 : f32
    %6 = vector.broadcast %cst_5 : f32 to vector<8x128xf32>
    %7 = arith.cmpf ogt, %5, %6 : vector<8x128xf32>
    %cst_6 = arith.constant 0.00999999977 : f32
    %8 = vector.broadcast %cst_6 : f32 to vector<8x128xf32>
    %9 = arith.mulf %8, %5 : vector<8x128xf32>
    %10 = arith.select %7, %5, %9 : vector<8x128xi1>, vector<8x128xf32>
    %c0_7 = arith.constant 0 : index
    %c0_8 = arith.constant 0 : index
    %11 = vector.load %arg4[%c0_7, %c0_8] : memref<128x128xf32, #tpu.memory_space<vmem>>, vector<128x128xf32>
    %cst_9 = arith.constant dense<0.000000e+00> : vector<8x128xf32>
    %12 = tpu.matmul %10, %11, %cst_9 {dimension_numbers = #tpu.dot_dimension_numbers<[1], [0], [0], [1], [0, 0, 1, 1], [], []>} : vector<8x128xf32>, vector<128x128xf32>, vector<8x128xf32> -> vector<8x128xf32>
    %c0_10 = arith.constant 0 : index
    %c0_11 = arith.constant 0 : index
    %13 = vector.load %arg5[%c0_10, %c0_11] : memref<1x128xf32, #tpu.memory_space<vmem>>, vector<1x128xf32>
    %14 = vector.broadcast %13 : vector<1x128xf32> to vector<8x128xf32>
    %15 = arith.addf %12, %14 : vector<8x128xf32>
    %cst_12 = arith.constant 0.000000e+00 : f32
    %16 = vector.broadcast %cst_12 : f32 to vector<8x128xf32>
    %17 = arith.cmpf ogt, %15, %16 : vector<8x128xf32>
    %cst_13 = arith.constant 0.00999999977 : f32
    %18 = vector.broadcast %cst_13 : f32 to vector<8x128xf32>
    %19 = arith.mulf %18, %15 : vector<8x128xf32>
    %20 = arith.select %17, %15, %19 : vector<8x128xi1>, vector<8x128xf32>
    %c0_14 = arith.constant 0 : index
    %c0_15 = arith.constant 0 : index
    %21 = vector.load %arg6[%c0_14, %c0_15] : memref<128x128xf32, #tpu.memory_space<vmem>>, vector<128x128xf32>
    %cst_16 = arith.constant dense<0.000000e+00> : vector<8x128xf32>
    %22 = tpu.matmul %20, %21, %cst_16 {dimension_numbers = #tpu.dot_dimension_numbers<[1], [0], [0], [1], [0, 0, 1, 1], [], []>} : vector<8x128xf32>, vector<128x128xf32>, vector<8x128xf32> -> vector<8x128xf32>
    %c0_17 = arith.constant 0 : index
    %c0_18 = arith.constant 0 : index
    %23 = vector.load %arg7[%c0_17, %c0_18] : memref<1x128xf32, #tpu.memory_space<vmem>>, vector<1x128xf32>
    %24 = vector.broadcast %23 : vector<1x128xf32> to vector<8x128xf32>
    %25 = arith.addf %22, %24 : vector<8x128xf32>
    %c0_19 = arith.constant 0 : index
    %c0_20 = arith.constant 0 : index
    %26 = vector.load %arg8[%c0_19, %c0_20] : memref<8x128xf32, #tpu.memory_space<vmem>>, vector<8x128xf32>
    tpu.vector_store %arg8[%c0_19, %c0_20], %25 {strides = array<i32>} : memref<8x128xf32, #tpu.memory_space<vmem>>, vector<8x128xf32>,
    return
  }
  func.func @transform_0(%arg0: i32) -> (i32, i32) {
    %c0_i32 = arith.constant 0 : i32
    %c0_i32_0 = arith.constant 0 : i32
    return %arg0, %c0_i32 : i32, i32
  }
  func.func @transform_1(%arg0: i32) -> (i32, i32) {
    %c0_i32 = arith.constant 0 : i32
    %c0_i32_0 = arith.constant 0 : i32
    %c0_i32_1 = arith.constant 0 : i32
    return %c0_i32, %c0_i32_0 : i32, i32
  }
  func.func @transform_2(%arg0: i32) -> (i32, i32) {
    %c0_i32 = arith.constant 0 : i32
    %c0_i32_0 = arith.constant 0 : i32
    %c0_i32_1 = arith.constant 0 : i32
    return %c0_i32, %c0_i32_0 : i32, i32
  }
  func.func @transform_3(%arg0: i32) -> (i32, i32) {
    %c0_i32 = arith.constant 0 : i32
    %c0_i32_0 = arith.constant 0 : i32
    %c0_i32_1 = arith.constant 0 : i32
    return %c0_i32, %c0_i32_0 : i32, i32
  }
  func.func @transform_4(%arg0: i32) -> (i32, i32) {
    %c0_i32 = arith.constant 0 : i32
    %c0_i32_0 = arith.constant 0 : i32
    %c0_i32_1 = arith.constant 0 : i32
    return %c0_i32, %c0_i32_0 : i32, i32
  }
  func.func @transform_5(%arg0: i32) -> (i32, i32) {
    %c0_i32 = arith.constant 0 : i32
    %c0_i32_0 = arith.constant 0 : i32
    %c0_i32_1 = arith.constant 0 : i32
    return %c0_i32, %c0_i32_0 : i32, i32
  }
  func.func @transform_6(%arg0: i32) -> (i32, i32) {
    %c0_i32 = arith.constant 0 : i32
    %c0_i32_0 = arith.constant 0 : i32
    %c0_i32_1 = arith.constant 0 : i32
    return %c0_i32, %c0_i32_0 : i32, i32
  }
  func.func @transform_7(%arg0: i32) -> (i32, i32) {
    %c0_i32 = arith.constant 0 : i32
    %c0_i32_0 = arith.constant 0 : i32
    return %arg0, %c0_i32 : i32, i32
  }
}

</mosaic_0001>

<bundles_post_ra>
// kernel: critic_forward.1
= control target key start
LH: loop header
LB: loop body
LE: loop exit
PB: predicated region body
PF: predicated region fallthrough
CT: control target
= control target key end

     0   :  { %v490_v0 = vmov 0.0|0.0   ;;  %vm491_vm0 = vmmov 0   ;;  %v492_v4 = vmov 0.0   ;;  %vm38_vm1 = vcmask 261120   ;;  %s677_s1 = inlined_call_operand.vmem [shape: f32[32,128], index: 1, kind: input, shape index: {}]   ;;  %s678_s3 = inlined_call_operand.vmem [shape: f32[128,128], index: 3, kind: input, shape index: {}]   ;;  %s679_s0 = inlined_call_operand.vmem [shape: f32[8,32], index: 0, kind: input, shape index: {}]   ;;  %s680_s5 = inlined_call_operand.vmem [shape: f32[128,128], index: 5, kind: input, shape index: {}]   ;;  %s681_s2 = inlined_call_operand.vmem [shape: f32[1,128], index: 2, kind: input, shape index: {}]   ;;  %s682_s4 = inlined_call_operand.vmem [shape: f32[1,128], index: 4, kind: input, shape index: {}]   ;;  %s683_s6 = inlined_call_operand.vmem [shape: f32[1,128], index: 6, kind: input, shape index: {}]   ;;  %s684_s7 = inlined_call_operand.vmem [shape: f32[8,128], index: 7, kind: output, shape index: {}]  }
   0x1   :  { %433 = vmatprep.subr.bf16.mxu0 %v490_v0  ;;  %v27_v1 = vld [vmem:[%s677_s1] sm:$0xff]  ;;  %v28_v2 = vld [vmem:[%s677_s1 + $0x8] sm:$0xff]  ;;  %v29_v3 = vld [vmem:[%s677_s1 + $0x10] sm:$0xff]  ;;  %360 = vmatprep.mubr.msk.f32.mxu0 %vm491_vm0, %v492_v4 }
   0x2   :  { %v434_v5 = vpack.c.bf16 %v28_v2, %v27_v1  ;;  %v30_v6 = vld [vmem:[%s677_s1 + $0x18] sm:$0xff]  ;;  %439 = vmatprep.subr.bf16.mxu1 %v490_v0  ;;  %v115_v7 = vld [vmem:[%s678_s3] sm:$0xff]  ;;  %395 = vmatprep.mubr.msk.f32.mxu1 %vm491_vm0, %v492_v4  ;;  %v116_v8 = vld [vmem:[%s678_s3 + $0x8] sm:$0xff] }
   0x3   :  { %v117_v9 = vld [vmem:[%s678_s3 + $0x10] sm:$0xff]  ;;  %v118_v10 = vld [vmem:[%s678_s3 + $0x18] sm:$0xff]  ;;  %v437_v11 = vpack.c.bf16 %v30_v6, %v29_v3  ;;  %v440_v12 = vpack.c.bf16 %v116_v8, %v115_v7  ;;  %v119_v14 = vld [vmem:[%s678_s3 + $0x20] sm:$0xff] }
   0x4   :  { %435 = vmatpush3.bf16.msra.mxu0 %v434_v5  ;;  %v443_v13 = vpack.c.bf16 %v118_v10, %v117_v9  ;;  %v120_v15 = vld [vmem:[%s678_s3 + $0x28] sm:$0xff]  ;;  %v26_v16 = vld [vmem:[%s679_s0] sm:$0xff]  ;;  %v121_v18 = vld [vmem:[%s678_s3 + $0x30] sm:$0xff] }
   0x5   :  { %436 = vmatprep.subr.bf16.mxu0 %v490_v0  ;;  %441 = vmatpush3.bf16.msra.mxu1 %v440_v12  ;;  %v446_v17 = vpack.c.bf16 %v120_v15, %v119_v14  ;;  %v122_v19 = vld [vmem:[%s678_s3 + $0x38] sm:$0xff]  ;;  %v123_v21 = vld [vmem:[%s678_s3 + $0x40] sm:$0xff]  ;;  %v124_v22 = vld [vmem:[%s678_s3 + $0x48] sm:$0xff] }
   0x6   :  { %442 = vmatprep.subr.bf16.mxu1 %v490_v0  ;;  %v449_v20 = vpack.c.bf16 %v122_v19, %v121_v18  ;;  %v452_v23 = vpack.c.bf16 %v124_v22, %v123_v21  ;;  %v125_v24 = vld [vmem:[%s678_s3 + $0x50] sm:$0xff]  ;;  %v126_v25 = vld [vmem:[%s678_s3 + $0x58] sm:$0xff]  ;;  %v127_v27 = vld [vmem:[%s678_s3 + $0x60] sm:$0xff] }
   0x7   :  { %v455_v26 = vpack.c.bf16 %v126_v25, %v125_v24  ;;  %v128_v28 = vld [vmem:[%s678_s3 + $0x68] sm:$0xff]  ;;  %v129_v30 = vld [vmem:[%s678_s3 + $0x70] sm:$0xff]  ;;  %v130_v31 = vld [vmem:[%s678_s3 + $0x78] sm:$0xff] }
   0x8   :  { %438 = vmatpush3.bf16.msra.mxu0 %v437_v11  ;;  %v458_v29 = vpack.c.bf16 %v128_v28, %v127_v27  ;;  %v461_v32 = vpack.c.bf16 %v130_v31, %v129_v30  ;;  %v211_v33 = vld [vmem:[%s680_s5] sm:$0xff]  ;;  %v212_v34 = vld [vmem:[%s680_s5 + $0x8] sm:$0xff]  ;;  %v213_v35 = vld [vmem:[%s680_s5 + $0x10] sm:$0xff] }
   0x9   :  { %463 = vmatprep.subr.bf16.mxu0 %v490_v0  ;;  %444 = vmatpush3.bf16.msra.mxu1 %v443_v13  ;;  %v464_v36 = vpack.c.bf16 %v212_v34, %v211_v33  ;;  %v214_v37 = vld [vmem:[%s680_s5 + $0x18] sm:$0xff]  ;;  %v215_v39 = vld [vmem:[%s680_s5 + $0x20] sm:$0xff]  ;;  %v216_v40 = vld [vmem:[%s680_s5 + $0x28] sm:$0xff] }
   0xa   :  { %445 = vmatprep.subr.bf16.mxu1 %v490_v0  ;;  %v467_v38 = vpack.c.bf16 %v214_v37, %v213_v35  ;;  %v470_v41 = vpack.c.bf16 %v216_v40, %v215_v39  ;;  %v217_v42 = vld [vmem:[%s680_s5 + $0x30] sm:$0xff]  ;;  %v218_v43 = vld [vmem:[%s680_s5 + $0x38] sm:$0xff]  ;;  %v219_v45 = vld [vmem:[%s680_s5 + $0x40] sm:$0xff] }
   0xb   :  { %361 = vmatmul.mubr.msk.f32.vlgmr.msra.gmra.mrb[0].mxu0 %vm38_vm1, %v26_v16  ;;  %v473_v44 = vpack.c.bf16 %v218_v43, %v217_v42  ;;  %v220_v46 = vld [vmem:[%s680_s5 + $0x48] sm:$0xff]  ;;  %v221_v48 = vld [vmem:[%s680_s5 + $0x50] sm:$0xff]  ;;  %v222_v49 = vld [vmem:[%s680_s5 + $0x58] sm:$0xff] }
   0xc   :  { %430 = vmatprep.mubr.msk.f32.mxu0 %vm491_vm0, %v492_v4  ;;  %465 = vmatpush3.bf16.msra.mxu0 %v464_v36  ;;  %v476_v47 = vpack.c.bf16 %v220_v46, %v219_v45  ;;  %v479_v50 = vpack.c.bf16 %v222_v49, %v221_v48  ;;  %v223_v51 = vld [vmem:[%s680_s5 + $0x60] sm:$0xff]  ;;  %v224_v52 = vld [vmem:[%s680_s5 + $0x68] sm:$0xff]  ;;  %v225_v60 = vld [vmem:[%s680_s5 + $0x70] sm:$0xff] }
   0xd   :  { %447 = vmatpush3.bf16.msra.mxu1 %v446_v17  ;;  %466 = vmatprep.subr.bf16.mxu0 %v490_v0  ;;  %v482_v53 = vpack.c.bf16 %v224_v52, %v223_v51  ;;  %v309_v54 = vld [vmem:[%s681_s2] ss:$0 sm:$0xff]  ;;  %v226_v61 = vld [vmem:[%s680_s5 + $0x78] sm:$0xff] }
   0xe   :  { %448 = vmatprep.subr.bf16.mxu1 %v490_v0  ;;  %v485_v62 = vpack.c.bf16 %v226_v61, %v225_v60  ;;  %v311_v63 = vld [vmem:[%s682_s4] ss:$0 sm:$0xff] }
   0xf   :  { %v312_v5 = vld [vmem:[%s683_s6] ss:$0 sm:$0xff] }
  0x10   :  { %468 = vmatpush3.bf16.msra.mxu0 %v467_v38 }
  0x11   :  { %450 = vmatpush3.bf16.msra.mxu1 %v449_v20  ;;  %469 = vmatprep.subr.bf16.mxu0 %v490_v0 }
  0x12   :  { %451 = vmatprep.subr.bf16.mxu1 %v490_v0 }
  0x14   :  { %471 = vmatpush3.bf16.msra.mxu0 %v470_v41 }
  0x15   :  { %453 = vmatpush3.bf16.msra.mxu1 %v452_v23  ;;  %472 = vmatprep.subr.bf16.mxu0 %v490_v0 }
  0x16   :  { %454 = vmatprep.subr.bf16.mxu1 %v490_v0 }
  0x18   :  { %474 = vmatpush3.bf16.msra.mxu0 %v473_v44 }
  0x19   :  { %456 = vmatpush3.bf16.msra.mxu1 %v455_v26  ;;  %475 = vmatprep.subr.bf16.mxu0 %v490_v0 }
  0x1a   :  { %457 = vmatprep.subr.bf16.mxu1 %v490_v0 }
  0x1c   :  { %477 = vmatpush3.bf16.msra.mxu0 %v476_v47 }
  0x1d   :  { %459 = vmatpush3.bf16.msra.mxu1 %v458_v29  ;;  %478 = vmatprep.subr.bf16.mxu0 %v490_v0 }
  0x1e   :  { %460 = vmatprep.subr.bf16.mxu1 %v490_v0 }
  0x20   :  { %480 = vmatpush3.bf16.msra.mxu0 %v479_v50 }
  0x21   :  { %462 = vmatpush3.bf16.msra.mxu1 %v461_v32  ;;  %481 = vmatprep.subr.bf16.mxu0 %v490_v0 }
  0x24   :  { %483 = vmatpush3.bf16.msra.mxu0 %v482_v53 }
  0x25   :  { %484 = vmatprep.subr.bf16.mxu0 %v490_v0 }
  0x28   :  { %486 = vmatpush3.bf16.msra.mxu0 %v485_v62 }
  0xde   :  { %v108_v55 = vpop.f32.mrb[0].mxu0 }
  0xdf   :  { %v109_v56 = vadd.f32 %v309_v54, %v108_v55  ;;  %v362_v57 = vpop.f32.mrb[1].mxu0 }
  0xe1   :  { %v113_v58 = vmul.f32 0.01, %v109_v56  ;;  %vm112_vm2 = vcmp.gt.f32.partialorder %v109_v56, 0.0 }
  0xe3   :  { %v114_v59 = vsel %vm112_vm2, %v109_v56, %v113_v58 }
  0xe4   :  { %396 = vmatmul.mubr.f32.vlgmr.msra.gmra.mrb[0].mxu1 %v114_v59 }
 0x1b7   :  { %v204_v0 = vpop.f32.mrb[0].mxu1 }
 0x1b8   :  { %v205_v1 = vadd.f32 %v311_v63, %v204_v0  ;;  %v397_v2 = vpop.f32.mrb[1].mxu1 }
 0x1ba   :  { %vm208_vm3 = vcmp.gt.f32.partialorder %v205_v1, 0.0  ;;  %v209_v3 = vmul.f32 0.01, %v205_v1 }
 0x1bc   :  { %v210_v4 = vsel %vm208_vm3, %v205_v1, %v209_v3 }
 0x1bd   :  { %431 = vmatmul.mubr.f32.vlgmr.msra.gmra.mrb[2].mxu0 %v210_v4 }
 0x290   :  { %v300_v6 = vpop.f32.mrb[2].mxu0 }
 0x291   :  { %v301_v7 = vadd.f32 %v312_v5, %v300_v6  ;;  %v432_v8 = vpop.f32.mrb[3].mxu0 }
 0x293   :  { %304 = vst [vmem:[%s684_s7] sm:$0xff] %v301_v7 }

</bundles_post_ra>
